<compile_context>
chip_gen: v5e
topology: v5e:2x2
jax: 0.10.0
libtpu: 0.0.40
codegen_flags: <defaults>
</compile_context>

<pallas_src>
import math
import jax
import jax.numpy as jnp
from jax.experimental import pallas as pl
from jax.experimental.pallas import tpu as pltpu


def _round_up(x, m):
    return (x + m - 1) // m * m


def _cdiv(a, b):
    return (a + b - 1) // b


def _fc_decoder_kernel(hs_ref, w1_ref, b1_ref, w2_ref, b2_ref, out_ref):
    """One batch-tile grid step (whole forward for that tile).

    hs_ref : (input_num, batch_tile, dim_ff)  bf16
    w1_ref : (input_num, dim_ff, hidden_p)    bf16  (lane-padded columns are zero)
    b1_ref : (1, hidden_p)                    f32
    w2_ref : (hidden_p, nc_p)                 bf16  (padded ROWS are zero)
    b2_ref : (1, nc_p)                        f32
    out_ref: (batch_tile, nc_p)               f32
    """
    input_num = hs_ref.shape[0]

    # x @ W1 where x = permute(1,0,2)+flatten(1) of hs  ==  sum_k hs[k] @ W1[k].
    # input_num is tiny (typically 3) -> statically unrolled MXU dots with f32
    # accumulation; layer-1 bias folded into the first partial sum.
    acc = jnp.dot(hs_ref[0], w1_ref[0],
                  preferred_element_type=jnp.float32) + b1_ref[...]
    for k in range(1, input_num):
        acc = acc + jnp.dot(hs_ref[k], w1_ref[k],
                            preferred_element_type=jnp.float32)

    # Sigmoid in f32 (EUP); Dropout is identity at inference time.
    h = jax.nn.sigmoid(acc)

    # Layer 2 on the MXU, bias add, lane-dense store.
    o = jnp.dot(h.astype(jnp.bfloat16), w2_ref[...],
                preferred_element_type=jnp.float32)
    out_ref[...] = (o + b2_ref[...]).astype(out_ref.dtype)


def _choose_batch_tile(batch, input_num, dim_ff, hidden_p, nc_p, requested):
    """Pick a 16-aligned batch tile that keeps all resident buffers ~<=40 MiB."""
    if requested is not None:
        bt = max(16, _round_up(requested, 16))
    else:
        budget = 40 * 1024 * 1024
        # Constant-index blocks, counted double-buffered (safe if Buffered(1)
        # is unavailable on this JAX build).
        fixed = (2 * input_num * dim_ff * hidden_p * 2   # W1 (bf16)
                 + 2 * hidden_p * nc_p * 2               # W2 (bf16)
                 + 2 * (hidden_p + nc_p) * 4)            # biases (f32)
        per_row = (2 * input_num * dim_ff * 2            # hs double buffer (bf16)
                   + 2 * nc_p * 4                        # out double buffer (f32)
                   + hidden_p * 4)                       # f32 accumulator temp
        avail = max(budget - fixed, 256 * 1024)
        bt = max(16, min(1024, (avail // per_row) // 16 * 16))
    # v7x megacore: with a large batch, make sure there are >= 2 batch tiles so
    # both TensorCores get work when the batch axis is sharded.
    if batch >= 64:
        bt = min(bt, max(16, _round_up(_cdiv(batch, 2), 16)))
    # Never make the tile larger than the (16-padded) batch itself.
    bt = min(bt, _round_up(batch, 16))
    return max(bt, 16)


def fc_decoder_forward(hs, w1, b1, w2, b2, *, batch_tile=None):
    """FC_Decoder forward (eval mode).

    hs: (input_num, batch, dim_ff)
    w1: (dim_ff*input_num, hidden)  stored as (in, out), i.e. PyTorch W1.T
    b1: (hidden,) or (1, hidden)
    w2: (hidden, num_class)         stored as (in, out)
    b2: (num_class,) or (1, num_class)
    Returns (batch, num_class) f32.
    """
    input_num, batch, dim_ff = hs.shape
    d_in, hidden = w1.shape
    num_class = w2.shape[1]
    assert d_in == input_num * dim_ff

    b1 = jnp.asarray(b1, jnp.float32).reshape(1, hidden)
    b2 = jnp.asarray(b2, jnp.float32).reshape(1, num_class)

    # Lane-dense padding of the narrow feature dims to multiples of 128.
    # W1's padded columns are zero and W2's padded ROWS are zero, so the
    # sigmoid(0)=0.5 values in padded hidden lanes contribute nothing.
    hidden_p = _round_up(hidden, 128)
    nc_p = _round_up(num_class, 128)
    w1_p = jnp.zeros((d_in, hidden_p), jnp.bfloat16).at[:, :hidden].set(
        w1.astype(jnp.bfloat16))
    # Reshape so chunk k of W1 (rows k*dim_ff:(k+1)*dim_ff) is w1_r[k].
    w1_r = w1_p.reshape(input_num, dim_ff, hidden_p)
    b1_p = jnp.zeros((1, hidden_p), jnp.float32).at[:, :hidden].set(b1)
    w2_p = jnp.zeros((hidden_p, nc_p), jnp.bfloat16).at[:hidden, :num_class].set(
        w2.astype(jnp.bfloat16))
    b2_p = jnp.zeros((1, nc_p), jnp.float32).at[:, :num_class].set(b2)

    # hs is the dominant HBM stream: cast to bf16 in the wrapper (matmuls are
    # bf16 anyway) and pad the batch to a 16-aligned tile multiple.
    hs_b = hs.astype(jnp.bfloat16)
    bt = _choose_batch_tile(batch, input_num, dim_ff, hidden_p, nc_p, batch_tile)
    batch_p = _round_up(batch, bt)
    if batch_p != batch:
        hs_b = jnp.pad(hs_b, ((0, 0), (0, batch_p - batch), (0, 0)))
    n_btiles = batch_p // bt

    cost = pl.CostEstimate(
        flops=2 * batch_p * (d_in * hidden_p + hidden_p * nc_p),
        transcendentals=batch_p * hidden_p,
        bytes_accessed=(hs_b.size * 2 + w1_r.size * 2 + w2_p.size * 2
                        + b1_p.size * 4 + b2_p.size * 4 + batch_p * nc_p * 4),
    )

    def _run(single_buffer_weights):
        pm = pl.Buffered(1) if single_buffer_weights else None

        def const_spec(shape):
            zero_idx = (0,) * len(shape)
            if pm is None:
                return pl.BlockSpec(shape, lambda b, _z=zero_idx: _z)
            return pl.BlockSpec(shape, lambda b, _z=zero_idx: _z,
                                pipeline_mode=pm)

        grid_spec = pltpu.PrefetchScalarGridSpec(
            num_scalar_prefetch=0,
            grid=(n_btiles,),
            in_specs=[
                # (input_num, batch_tile, dim_ff) slab of hs for this batch tile;
                # the permute+flatten is fused as the in-kernel k loop.
                pl.BlockSpec((input_num, bt, dim_ff), lambda b: (0, b, 0)),
                # Weights / biases: constant index_maps -> fetched once, VMEM-resident.
                const_spec((input_num, dim_ff, hidden_p)),
                const_spec((1, hidden_p)),
                const_spec((hidden_p, nc_p)),
                const_spec((1, nc_p)),
            ],
            out_specs=pl.BlockSpec((bt, nc_p), lambda b: (b, 0)),
        )
        return pl.pallas_call(
            _fc_decoder_kernel,
            out_shape=jax.ShapeDtypeStruct((batch_p, nc_p), jnp.float32),
            grid_spec=grid_spec,
            compiler_params=pltpu.CompilerParams(
                dimension_semantics=("parallel",),
                vmem_limit_bytes=64 * 1024 * 1024,
            ),
            cost_estimate=cost,
        )(hs_b, w1_r, b1_p, w2_p, b2_p)

    try:
        out_p = _run(single_buffer_weights=True)
    except Exception:
        # Older/newer JAX builds may reject pipeline_mode=pl.Buffered(1);
        # fall back to default (double) buffering of the constant blocks.
        out_p = _run(single_buffer_weights=False)

    return out_p[:batch, :num_class]


def init_params(key, dim_feedforward, num_class, input_num=3):
    """Deterministic init mimicking nn.Linear default (uniform +-1/sqrt(fan_in))."""
    d_in1 = dim_feedforward * input_num
    d_out1 = dim_feedforward // input_num
    d_in2 = d_out1
    d_out2 = num_class
    k1, k2, k3, k4 = jax.random.split(key, 4)
    bound1 = 1.0 / math.sqrt(d_in1)
    bound2 = 1.0 / math.sqrt(d_in2)
    # Stored as (in_features, out_features) => x @ W matches PyTorch x @ W.T
    w1 = jax.random.uniform(k1, (d_in1, d_out1), jnp.float32, -bound1, bound1)
    b1 = jax.random.uniform(k2, (1, d_out1), jnp.float32, -bound1, bound1)
    w2 = jax.random.uniform(k3, (d_in2, d_out2), jnp.float32, -bound2, bound2)
    b2 = jax.random.uniform(k4, (1, d_out2), jnp.float32, -bound2, bound2)
    return w1, b1, w2, b2


if __name__ == "__main__":
    # Small shapes consistent with the module's forward:
    # hs: (input_num=3, batch=8, dim_feedforward=32), num_class=16
    input_num = 3
    batch = 8
    dim_feedforward = 32
    num_class = 16

    key = jax.random.PRNGKey(0)
    k_x, k_p = jax.random.split(key)
    hs = jax.random.normal(k_x, (input_num, batch, dim_feedforward), jnp.float32)
    w1, b1, w2, b2 = init_params(k_p, dim_feedforward, num_class, input_num)

    out = fc_decoder_forward(hs, w1, b1, w2, b2)
    out = jax.block_until_ready(out)

    # Pure-JAX reference of the same math (bf16 matmul inputs, f32 accumulate),
    # matching the kernel's precision choices.
    x_ref = jnp.transpose(hs, (1, 0, 2)).reshape(batch, -1)
    h_ref = jax.nn.sigmoid(
        jnp.dot(x_ref.astype(jnp.bfloat16), w1.astype(jnp.bfloat16),
                preferred_element_type=jnp.float32) + b1)
    ref = jnp.dot(h_ref.astype(jnp.bfloat16), w2.astype(jnp.bfloat16),
                  preferred_element_type=jnp.float32) + b2

    assert out.shape == (batch, num_class)
    assert jnp.allclose(out, ref, atol=5e-3, rtol=5e-3), (
        f"max abs diff {jnp.max(jnp.abs(out - ref))}")

    print("KERNEL_OK")
</pallas_src>

<mosaic_0001>
module attributes {stable_mosaic.version = 11 : i64} {
  func.func @_fc_decoder_kernel(%arg0: i32, %arg1: memref<3x16x32xbf16, #tpu.memory_space<vmem>>, %arg2: memref<3x32x128xbf16, #tpu.memory_space<vmem>>, %arg3: memref<1x128xf32, #tpu.memory_space<vmem>>, %arg4: memref<128x128xbf16, #tpu.memory_space<vmem>>, %arg5: memref<1x128xf32, #tpu.memory_space<vmem>>, %arg6: memref<16x128xf32, #tpu.memory_space<vmem>>) attributes {dimension_semantics = [#tpu.dimension_semantics<parallel>], iteration_bounds = array<i64: 1>, scalar_prefetch = 0 : i64, scratch_operands = 0 : i64, tpu.core_type = #tpu.core_type<tc>, window_params = [{transform_indices = @transform_0, window_bounds = array<i64: 3, 16, 32>}, {pipeline_mode = #tpu.pipeline_mode<synchronous>, transform_indices = @transform_1, window_bounds = array<i64: 3, 32, 128>}, {pipeline_mode = #tpu.pipeline_mode<synchronous>, transform_indices = @transform_2, window_bounds = array<i64: 1, 128>}, {pipeline_mode = #tpu.pipeline_mode<synchronous>, transform_indices = @transform_3, window_bounds = array<i64: 128, 128>}, {pipeline_mode = #tpu.pipeline_mode<synchronous>, transform_indices = @transform_4, window_bounds = array<i64: 1, 128>}, {transform_indices = @transform_5, window_bounds = array<i64: 16, 128>}]} {
    %c0 = arith.constant 0 : index
    %c0_0 = arith.constant 0 : index
    %c0_1 = arith.constant 0 : index
    %0 = vector.load %arg1[%c0, %c0_0, %c0_1] : memref<3x16x32xbf16, #tpu.memory_space<vmem>>, vector<1x16x32xbf16>
    %1 = vector.shape_cast %0 : vector<1x16x32xbf16> to vector<16x32xbf16>
    %c0_2 = arith.constant 0 : index
    %c0_3 = arith.constant 0 : index
    %c0_4 = arith.constant 0 : index
    %2 = vector.load %arg2[%c0_2, %c0_3, %c0_4] : memref<3x32x128xbf16, #tpu.memory_space<vmem>>, vector<1x32x128xbf16>
    %3 = vector.shape_cast %2 : vector<1x32x128xbf16> to vector<32x128xbf16>
    %cst = arith.constant dense<0.000000e+00> : vector<16x128xf32>
    %4 = tpu.matmul %1, %3, %cst {dimension_numbers = #tpu.dot_dimension_numbers<[1], [0], [0], [1], [0, 0, 1, 1], [], []>} : vector<16x32xbf16>, vector<32x128xbf16>, vector<16x128xf32> -> vector<16x128xf32>
    %c0_5 = arith.constant 0 : index
    %c0_6 = arith.constant 0 : index
    %5 = vector.load %arg3[%c0_5, %c0_6] : memref<1x128xf32, #tpu.memory_space<vmem>>, vector<1x128xf32>
    %6 = vector.broadcast %5 : vector<1x128xf32> to vector<16x128xf32>
    %7 = arith.addf %4, %6 : vector<16x128xf32>
    %c1 = arith.constant 1 : index
    %c0_7 = arith.constant 0 : index
    %c0_8 = arith.constant 0 : index
    %8 = vector.load %arg1[%c1, %c0_7, %c0_8] : memref<3x16x32xbf16, #tpu.memory_space<vmem>>, vector<1x16x32xbf16>
    %9 = vector.shape_cast %8 : vector<1x16x32xbf16> to vector<16x32xbf16>
    %c1_9 = arith.constant 1 : index
    %c0_10 = arith.constant 0 : index
    %c0_11 = arith.constant 0 : index
    %10 = vector.load %arg2[%c1_9, %c0_10, %c0_11] : memref<3x32x128xbf16, #tpu.memory_space<vmem>>, vector<1x32x128xbf16>
    %11 = vector.shape_cast %10 : vector<1x32x128xbf16> to vector<32x128xbf16>
    %cst_12 = arith.constant dense<0.000000e+00> : vector<16x128xf32>
    %12 = tpu.matmul %9, %11, %cst_12 {dimension_numbers = #tpu.dot_dimension_numbers<[1], [0], [0], [1], [0, 0, 1, 1], [], []>} : vector<16x32xbf16>, vector<32x128xbf16>, vector<16x128xf32> -> vector<16x128xf32>
    %13 = arith.addf %7, %12 : vector<16x128xf32>
    %c2 = arith.constant 2 : index
    %c0_13 = arith.constant 0 : index
    %c0_14 = arith.constant 0 : index
    %14 = vector.load %arg1[%c2, %c0_13, %c0_14] : memref<3x16x32xbf16, #tpu.memory_space<vmem>>, vector<1x16x32xbf16>
    %15 = vector.shape_cast %14 : vector<1x16x32xbf16> to vector<16x32xbf16>
    %c2_15 = arith.constant 2 : index
    %c0_16 = arith.constant 0 : index
    %c0_17 = arith.constant 0 : index
    %16 = vector.load %arg2[%c2_15, %c0_16, %c0_17] : memref<3x32x128xbf16, #tpu.memory_space<vmem>>, vector<1x32x128xbf16>
    %17 = vector.shape_cast %16 : vector<1x32x128xbf16> to vector<32x128xbf16>
    %cst_18 = arith.constant dense<0.000000e+00> : vector<16x128xf32>
    %18 = tpu.matmul %15, %17, %cst_18 {dimension_numbers = #tpu.dot_dimension_numbers<[1], [0], [0], [1], [0, 0, 1, 1], [], []>} : vector<16x32xbf16>, vector<32x128xbf16>, vector<16x128xf32> -> vector<16x128xf32>
    %19 = arith.addf %13, %18 : vector<16x128xf32>
    %20 = arith.negf %19 : vector<16x128xf32>
    %21 = math.exp %20 : vector<16x128xf32>
    %cst_19 = arith.constant 1.000000e+00 : f32
    %22 = vector.broadcast %cst_19 : f32 to vector<16x128xf32>
    %23 = arith.addf %22, %21 : vector<16x128xf32>
    %24 = arith.divf %22, %23 : vector<16x128xf32>
    %25 = arith.truncf %24 : vector<16x128xf32> to vector<16x128xbf16>
    %c0_20 = arith.constant 0 : index
    %c0_21 = arith.constant 0 : index
    %26 = vector.load %arg4[%c0_20, %c0_21] : memref<128x128xbf16, #tpu.memory_space<vmem>>, vector<128x128xbf16>
    %cst_22 = arith.constant dense<0.000000e+00> : vector<16x128xf32>
    %27 = tpu.matmul %25, %26, %cst_22 {dimension_numbers = #tpu.dot_dimension_numbers<[1], [0], [0], [1], [0, 0, 1, 1], [], []>} : vector<16x128xbf16>, vector<128x128xbf16>, vector<16x128xf32> -> vector<16x128xf32>
    %c0_23 = arith.constant 0 : index
    %c0_24 = arith.constant 0 : index
    %28 = vector.load %arg5[%c0_23, %c0_24] : memref<1x128xf32, #tpu.memory_space<vmem>>, vector<1x128xf32>
    %29 = vector.broadcast %28 : vector<1x128xf32> to vector<16x128xf32>
    %30 = arith.addf %27, %29 : vector<16x128xf32>
    %c0_25 = arith.constant 0 : index
    %c0_26 = arith.constant 0 : index
    %31 = vector.load %arg6[%c0_25, %c0_26] : memref<16x128xf32, #tpu.memory_space<vmem>>, vector<16x128xf32>
    tpu.vector_store %arg6[%c0_25, %c0_26], %30 {strides = array<i32>} : memref<16x128xf32, #tpu.memory_space<vmem>>, vector<16x128xf32>,
    return
  }
  func.func @transform_0(%arg0: i32) -> (i32, i32, i32) {
    %c0_i32 = arith.constant 0 : i32
    %c0_i32_0 = arith.constant 0 : i32
    %c0_i32_1 = arith.constant 0 : i32
    return %c0_i32, %arg0, %c0_i32_0 : i32, i32, i32
  }
  func.func @transform_1(%arg0: i32) -> (i32, i32, i32) {
    %c0_i32 = arith.constant 0 : i32
    %c0_i32_0 = arith.constant 0 : i32
    %c0_i32_1 = arith.constant 0 : i32
    %c0_i32_2 = arith.constant 0 : i32
    return %c0_i32, %c0_i32_0, %c0_i32_1 : i32, i32, i32
  }
  func.func @transform_2(%arg0: i32) -> (i32, i32) {
    %c0_i32 = arith.constant 0 : i32
    %c0_i32_0 = arith.constant 0 : i32
    %c0_i32_1 = arith.constant 0 : i32
    return %c0_i32, %c0_i32_0 : i32, i32
  }
  func.func @transform_3(%arg0: i32) -> (i32, i32) {
    %c0_i32 = arith.constant 0 : i32
    %c0_i32_0 = arith.constant 0 : i32
    %c0_i32_1 = arith.constant 0 : i32
    return %c0_i32, %c0_i32_0 : i32, i32
  }
  func.func @transform_4(%arg0: i32) -> (i32, i32) {
    %c0_i32 = arith.constant 0 : i32
    %c0_i32_0 = arith.constant 0 : i32
    %c0_i32_1 = arith.constant 0 : i32
    return %c0_i32, %c0_i32_0 : i32, i32
  }
  func.func @transform_5(%arg0: i32) -> (i32, i32) {
    %c0_i32 = arith.constant 0 : i32
    %c0_i32_0 = arith.constant 0 : i32
    return %arg0, %c0_i32 : i32, i32
  }
}

module attributes {stable_mosaic.version = 11 : i64} {
  func.func @_fc_decoder_kernel(%arg0: i32, %arg1: memref<3x16x32xbf16, #tpu.memory_space<vmem>>, %arg2: memref<3x32x128xbf16, #tpu.memory_space<vmem>>, %arg3: memref<1x128xf32, #tpu.memory_space<vmem>>, %arg4: memref<128x128xbf16, #tpu.memory_space<vmem>>, %arg5: memref<1x128xf32, #tpu.memory_space<vmem>>, %arg6: memref<16x128xf32, #tpu.memory_space<vmem>>) attributes {dimension_semantics = [#tpu.dimension_semantics<parallel>], iteration_bounds = array<i64: 1>, scalar_prefetch = 0 : i64, scratch_operands = 0 : i64, tpu.core_type = #tpu.core_type<tc>, window_params = [{transform_indices = @transform_0, window_bounds = array<i64: 3, 16, 32>}, {pipeline_mode = #tpu.pipeline_mode<synchronous>, transform_indices = @transform_1, window_bounds = array<i64: 3, 32, 128>}, {pipeline_mode = #tpu.pipeline_mode<synchronous>, transform_indices = @transform_2, window_bounds = array<i64: 1, 128>}, {pipeline_mode = #tpu.pipeline_mode<synchronous>, transform_indices = @transform_3, window_bounds = array<i64: 128, 128>}, {pipeline_mode = #tpu.pipeline_mode<synchronous>, transform_indices = @transform_4, window_bounds = array<i64: 1, 128>}, {transform_indices = @transform_5, window_bounds = array<i64: 16, 128>}]} {
    %c0 = arith.constant 0 : index
    %c0_0 = arith.constant 0 : index
    %c0_1 = arith.constant 0 : index
    %0 = vector.load %arg1[%c0, %c0_0, %c0_1] : memref<3x16x32xbf16, #tpu.memory_space<vmem>>, vector<1x16x32xbf16>
    %1 = vector.shape_cast %0 : vector<1x16x32xbf16> to vector<16x32xbf16>
    %c0_2 = arith.constant 0 : index
    %c0_3 = arith.constant 0 : index
    %c0_4 = arith.constant 0 : index
    %2 = vector.load %arg2[%c0_2, %c0_3, %c0_4] : memref<3x32x128xbf16, #tpu.memory_space<vmem>>, vector<1x32x128xbf16>
    %3 = vector.shape_cast %2 : vector<1x32x128xbf16> to vector<32x128xbf16>
    %cst = arith.constant dense<0.000000e+00> : vector<16x128xf32>
    %4 = tpu.matmul %1, %3, %cst {dimension_numbers = #tpu.dot_dimension_numbers<[1], [0], [0], [1], [0, 0, 1, 1], [], []>} : vector<16x32xbf16>, vector<32x128xbf16>, vector<16x128xf32> -> vector<16x128xf32>
    %c0_5 = arith.constant 0 : index
    %c0_6 = arith.constant 0 : index
    %5 = vector.load %arg3[%c0_5, %c0_6] : memref<1x128xf32, #tpu.memory_space<vmem>>, vector<1x128xf32>
    %6 = vector.broadcast %5 : vector<1x128xf32> to vector<16x128xf32>
    %7 = arith.addf %4, %6 : vector<16x128xf32>
    %c1 = arith.constant 1 : index
    %c0_7 = arith.constant 0 : index
    %c0_8 = arith.constant 0 : index
    %8 = vector.load %arg1[%c1, %c0_7, %c0_8] : memref<3x16x32xbf16, #tpu.memory_space<vmem>>, vector<1x16x32xbf16>
    %9 = vector.shape_cast %8 : vector<1x16x32xbf16> to vector<16x32xbf16>
    %c1_9 = arith.constant 1 : index
    %c0_10 = arith.constant 0 : index
    %c0_11 = arith.constant 0 : index
    %10 = vector.load %arg2[%c1_9, %c0_10, %c0_11] : memref<3x32x128xbf16, #tpu.memory_space<vmem>>, vector<1x32x128xbf16>
    %11 = vector.shape_cast %10 : vector<1x32x128xbf16> to vector<32x128xbf16>
    %cst_12 = arith.constant dense<0.000000e+00> : vector<16x128xf32>
    %12 = tpu.matmul %9, %11, %cst_12 {dimension_numbers = #tpu.dot_dimension_numbers<[1], [0], [0], [1], [0, 0, 1, 1], [], []>} : vector<16x32xbf16>, vector<32x128xbf16>, vector<16x128xf32> -> vector<16x128xf32>
    %13 = arith.addf %7, %12 : vector<16x128xf32>
    %c2 = arith.constant 2 : index
    %c0_13 = arith.constant 0 : index
    %c0_14 = arith.constant 0 : index
    %14 = vector.load %arg1[%c2, %c0_13, %c0_14] : memref<3x16x32xbf16, #tpu.memory_space<vmem>>, vector<1x16x32xbf16>
    %15 = vector.shape_cast %14 : vector<1x16x32xbf16> to vector<16x32xbf16>
    %c2_15 = arith.constant 2 : index
    %c0_16 = arith.constant 0 : index
    %c0_17 = arith.constant 0 : index
    %16 = vector.load %arg2[%c2_15, %c0_16, %c0_17] : memref<3x32x128xbf16, #tpu.memory_space<vmem>>, vector<1x32x128xbf16>
    %17 = vector.shape_cast %16 : vector<1x32x128xbf16> to vector<32x128xbf16>
    %cst_18 = arith.constant dense<0.000000e+00> : vector<16x128xf32>
    %18 = tpu.matmul %15, %17, %cst_18 {dimension_numbers = #tpu.dot_dimension_numbers<[1], [0], [0], [1], [0, 0, 1, 1], [], []>} : vector<16x32xbf16>, vector<32x128xbf16>, vector<16x128xf32> -> vector<16x128xf32>
    %19 = arith.addf %13, %18 : vector<16x128xf32>
    %20 = arith.negf %19 : vector<16x128xf32>
    %21 = math.exp %20 : vector<16x128xf32>
    %cst_19 = arith.constant 1.000000e+00 : f32
    %22 = vector.broadcast %cst_19 : f32 to vector<16x128xf32>
    %23 = arith.addf %22, %21 : vector<16x128xf32>
    %24 = arith.divf %22, %23 : vector<16x128xf32>
    %25 = arith.truncf %24 : vector<16x128xf32> to vector<16x128xbf16>
    %c0_20 = arith.constant 0 : index
    %c0_21 = arith.constant 0 : index
    %26 = vector.load %arg4[%c0_20, %c0_21] : memref<128x128xbf16, #tpu.memory_space<vmem>>, vector<128x128xbf16>
    %cst_22 = arith.constant dense<0.000000e+00> : vector<16x128xf32>
    %27 = tpu.matmul %25, %26, %cst_22 {dimension_numbers = #tpu.dot_dimension_numbers<[1], [0], [0], [1], [0, 0, 1, 1], [], []>} : vector<16x128xbf16>, vector<128x128xbf16>, vector<16x128xf32> -> vector<16x128xf32>
    %c0_23 = arith.constant 0 : index
    %c0_24 = arith.constant 0 : index
    %28 = vector.load %arg5[%c0_23, %c0_24] : memref<1x128xf32, #tpu.memory_space<vmem>>, vector<1x128xf32>
    %29 = vector.broadcast %28 : vector<1x128xf32> to vector<16x128xf32>
    %30 = arith.addf %27, %29 : vector<16x128xf32>
    %c0_25 = arith.constant 0 : index
    %c0_26 = arith.constant 0 : index
    %31 = vector.load %arg6[%c0_25, %c0_26] : memref<16x128xf32, #tpu.memory_space<vmem>>, vector<16x128xf32>
    tpu.vector_store %arg6[%c0_25, %c0_26], %30 {strides = array<i32>} : memref<16x128xf32, #tpu.memory_space<vmem>>, vector<16x128xf32>,
    return
  }
  func.func @transform_0(%arg0: i32) -> (i32, i32, i32) {
    %c0_i32 = arith.constant 0 : i32
    %c0_i32_0 = arith.constant 0 : i32
    %c0_i32_1 = arith.constant 0 : i32
    return %c0_i32, %arg0, %c0_i32_0 : i32, i32, i32
  }
  func.func @transform_1(%arg0: i32) -> (i32, i32, i32) {
    %c0_i32 = arith.constant 0 : i32
    %c0_i32_0 = arith.constant 0 : i32
    %c0_i32_1 = arith.constant 0 : i32
    %c0_i32_2 = arith.constant 0 : i32
    return %c0_i32, %c0_i32_0, %c0_i32_1 : i32, i32, i32
  }
  func.func @transform_2(%arg0: i32) -> (i32, i32) {
    %c0_i32 = arith.constant 0 : i32
    %c0_i32_0 = arith.constant 0 : i32
    %c0_i32_1 = arith.constant 0 : i32
    return %c0_i32, %c0_i32_0 : i32, i32
  }
  func.func @transform_3(%arg0: i32) -> (i32, i32) {
    %c0_i32 = arith.constant 0 : i32
    %c0_i32_0 = arith.constant 0 : i32
    %c0_i32_1 = arith.constant 0 : i32
    return %c0_i32, %c0_i32_0 : i32, i32
  }
  func.func @transform_4(%arg0: i32) -> (i32, i32) {
    %c0_i32 = arith.constant 0 : i32
    %c0_i32_0 = arith.constant 0 : i32
    %c0_i32_1 = arith.constant 0 : i32
    return %c0_i32, %c0_i32_0 : i32, i32
  }
  func.func @transform_5(%arg0: i32) -> (i32, i32) {
    %c0_i32 = arith.constant 0 : i32
    %c0_i32_0 = arith.constant 0 : i32
    return %arg0, %c0_i32 : i32, i32
  }
}

</mosaic_0001>

<bundles_post_ra>
// kernel: tpu_custom_call.1
= control target key start
LH: loop header
LB: loop body
LE: loop exit
PB: predicated region body
PF: predicated region fallthrough
CT: control target
= control target key end

     0   :  { %10 = vsyncpa [#allocation3], 0  ;;  %s611_s0 = inlined_call_operand.hbm [shape: bf16[3,16,32], index: 0, kind: input, shape index: {}]   ;;  %s612_s1 = inlined_call_operand.hbm [shape: bf16[3,32,128], index: 1, kind: input, shape index: {}]   ;;  %s613_s2 = inlined_call_operand.vmem [shape: f32[1,128], index: 2, kind: input, shape index: {}]   ;;  %s614_s3 = inlined_call_operand.hbm [shape: bf16[128,128], index: 3, kind: input, shape index: {}]   ;;  %s615_s4 = inlined_call_operand.vmem [shape: f32[1,128], index: 4, kind: input, shape index: {}]   ;;  %s616_s5 = inlined_call_operand.hbm [shape: f32[16,128], index: 5, kind: output, shape index: {}]  }
   0x1   :  { %11 = vsyncpa [#allocation6], 0 }
   0x2   :  { %12 = vsyncpa [#allocation4], 0  ;;  %s30_s20 = sshll.u32 %s612_s1, 4  ;;  %s555_s21 = smov [#allocation5]   ;;  %s31_s20 = int_to_ptr.hbm [resolvable:$true] %s30_s20 }
   0x3   :  { %s32_s22 = sshll.u32 %s555_s21, 4  ;;  %s17_s25 = sshll.u32 %s611_s0, 4  ;;  %s33_s22 = int_to_ptr.vmem [resolvable:$true] %s32_s22  ;;  %s18_s25 = int_to_ptr.hbm [resolvable:$true] %s17_s25 }
   0x4   :  { %s556_s26 = smov 64   ;;  %s557_s27 = smov 4  }
   0x5   :  { %38 = dma.hbm_to_vmem [thread:$0]  %s31_s20, 768, %s33_s22, [#allocation6], %s556_s26, %s556_s26, %s557_s27  }
   0x6   :  { %s558_s28 = smov [#allocation2]   ;;  %s45_s7 = sshll.u32 %s614_s3, 4  ;;  %s46_s7 = int_to_ptr.hbm [resolvable:$true] %s45_s7 }
   0x7   :  { %s19_s29 = sshll.u32 %s558_s28, 4  ;;  %s559_s1 = smov [#allocation7]   ;;  %s20_s29 = int_to_ptr.vmem [resolvable:$true] %s19_s29 }
   0x8   :  { %25 = dma.hbm_to_vmem [thread:$0]  %s18_s25, 384, %s20_s29, [#allocation3], %s556_s26, %s556_s26, %s557_s27  }
   0x9   :  { %s47_s8 = sshll.u32 %s559_s1, 4  ;;  %s48_s8 = int_to_ptr.vmem [resolvable:$true] %s47_s8 }
   0xa   :  { %53 = dma.hbm_to_vmem [thread:$0]  %s46_s7, 1024, %s48_s8, [#allocation6], %s556_s26, %s556_s26, %s557_s27  }
   0xb   :  { %549 = dma.done.wait [#allocation3], 384  }
   0xc   :  { %550 = vsyncadd [#allocation3], 4294966912 }
   0xd   :  { %551 = dma.done.wait [#allocation6], 1792  }
   0xe   :  { %552 = vsyncadd [#allocation6], 4294965504  ;;  %v420_v0 = vld [vmem:[#allocation5 + $0x8] sm:$0xff]  ;;  %v423_v1 = vld [vmem:[#allocation5 + $0x18] sm:$0xff]  ;;  %vm96_vm0 = vcmask 261120   ;;  %s560_s10 = smov [#allocation8]  }
   0xf   :  { %v426_v2 = vld [vmem:[#allocation5 + $0x28] sm:$0xff]  ;;  %106 = vmatpush.bf16.msra.mxu0 %v420_v0  ;;  %148 = vmatpush.bf16.msra.mxu1 %v423_v1  ;;  %v419_v3 = vld [vmem:[#allocation5] sm:$0xff]  ;;  %v422_v4 = vld [vmem:[#allocation5 + $0x10] sm:$0xff]  ;;  %s329_s11 = sshll.u32 %s560_s10, 4  ;;  %s331_s14 = sshll.u32 %s616_s5, 4  ;;  %s330_s11 = int_to_ptr.vmem [resolvable:$true] %s329_s11  ;;  %s332_s14 = int_to_ptr.hbm [resolvable:$true] %s331_s14 }
  0x10   :  { %192 = vmatpush.bf16.msra.mxu2 %v426_v2  ;;  %v425_v5 = vld [vmem:[#allocation5 + $0x20] sm:$0xff]  ;;  %v418_v6 = vld [vmem:[#allocation2] sm:$0xff]  ;;  %v421_v7 = vld [vmem:[#allocation2 + $0x8] sm:$0xff]  ;;  %s561_s15 = smov 128   ;;  %s562_s16 = smov 8  }
  0x11   :  { %v424_v8 = vld [vmem:[#allocation2 + $0x10] sm:$0xff]  ;;  %v434_v9 = vld [vmem:[#allocation7 + $0x38] sm:$0xff]  ;;  %v433_v10 = vld [vmem:[#allocation7 + $0x30] sm:$0xff] }
  0x12   :  { %309 = vmatpush.bf16.msra.mxu3 %v434_v9  ;;  %v432_v11 = vld [vmem:[#allocation7 + $0x28] sm:$0xff]  ;;  %v431_v12 = vld [vmem:[#allocation7 + $0x20] sm:$0xff]  ;;  %v443_v13 = vld [vmem:[%s613_s2] ss:$0 sm:$0xff] }
  0x13   :  { %107 = vmatpush.bf16.msra.mxu0 %v419_v3  ;;  %149 = vmatpush.bf16.msra.mxu1 %v422_v4  ;;  %v430_v14 = vld [vmem:[#allocation7 + $0x18] sm:$0xff]  ;;  %v429_v17 = vld [vmem:[#allocation7 + $0x10] sm:$0xff]  ;;  %v428_v20 = vld [vmem:[#allocation7 + $0x8] sm:$0xff] }
  0x14   :  { %193 = vmatpush.bf16.msra.mxu2 %v425_v5  ;;  %v427_v24 = vld [vmem:[#allocation7] sm:$0xff]  ;;  %v444_v57 = vld [vmem:[%s615_s4] ss:$0 sm:$0xff] }
  0x16   :  { %357 = vmatmul.msk.bf16.vlgmr.msra.gmra.mxu0 %vm96_vm0, %v418_v6  ;;  %370 = vmatmul.msk.bf16.vlgmr.msra.gmra.mxu1 %vm96_vm0, %v421_v7 }
  0x17   :  { %383 = vmatmul.msk.bf16.vlgmr.msra.gmra.mxu2 %vm96_vm0, %v424_v8  ;;  %310 = vmatpush.bf16.msra.mxu3 %v433_v10 }
  0x1b   :  { %311 = vmatpush.bf16.msra.mxu3 %v432_v11 }
  0x1f   :  { %312 = vmatpush.bf16.msra.mxu3 %v431_v12 }
  0x23   :  { %313 = vmatpush.bf16.msra.mxu3 %v430_v14 }
  0x27   :  { %314 = vmatpush.bf16.msra.mxu3 %v429_v17 }
  0x2b   :  { %315 = vmatpush.bf16.msra.mxu3 %v428_v20 }
  0x2f   :  { %316 = vmatpush.bf16.msra.mxu3 %v427_v24 }
  0x93   :  { %v109_v15 = vpop.f32.mrf.mxu0  ;;  %v151_v18 = vpop.f32.mrf.mxu1 }
  0x94   :  { %v110_v16 = vadd.f32 %v443_v13, %v109_v15 }
  0x96   :  { %v156_v19 = vadd.f32 %v151_v18, %v110_v16 }
  0x9a   :  { %v195_v21 = vpop.f32.mrf.mxu2 }
  0x9b   :  { %v200_v22 = vadd.f32 %v195_v21, %v156_v19  ;;  %v111_v23 = vpop.f32.mrf.mxu0  ;;  %v153_v27 = vpop.f32.mrf.mxu1 }
  0x9c   :  { %v112_v26 = vadd.f32 %v443_v13, %v111_v23 }
  0x9d   :  { %v384_v25 = vmul.f32 -1.442695, %v200_v22 }
  0x9e   :  { %v157_v28 = vadd.f32 %v153_v27, %v112_v26 }
  0x9f   :  { %445 = vpow2.f32 %v384_v25 }
  0xa2   :  { %v197_v29 = vpop.f32.mrf.mxu2 }
  0xa3   :  { %v201_v30 = vadd.f32 %v197_v29, %v157_v28 }
  0xa5   :  { %v446_v31 = vpop.eup %445  ;;  %v385_v32 = vmul.f32 -1.442695, %v201_v30 }
  0xa6   :  { %v208_v33 = vadd.f32 1.0, %v446_v31 }
  0xa7   :  { %447 = vpow2.f32 %v385_v32 }
  0xa8   :  { %449 = vrcp.f32 %v208_v33  ;;  %vm215_vm2 = vweird.f32 %v208_v33  ;;  %v221_v44 = vand.u32 2147483648, %v208_v33  ;;  %v219_v46 = vand.u32 2147483647, %v208_v33 }
  0xaa   :  { %v222_v51 = vor.u32 1.1754944e-38, %v221_v44  ;;  %vm220_vm7 = vcmp.eq.f32.partialorder %v219_v46, 8.507059e+37 }
  0xad   :  { %v448_v34 = vpop.eup %447 }
  0xae   :  { %v450_v35 = vpop.eup %449  ;;  %v209_v36 = vadd.f32 1.0, %v448_v34 }
  0xaf   :  { %v211_v37 = vmul.f32 %v450_v35, %v208_v33  ;;  %vm216_vm1 = vweird.f32 %v450_v35 }
  0xb0   :  { %451 = vrcp.f32 %v209_v36  ;;  %v236_v45 = vand.u32 2147483648, %v209_v36  ;;  %v234_v48 = vand.u32 2147483647, %v209_v36  ;;  %vm217_vm4 = vmor %vm215_vm2, %vm216_vm1  ;;  %vm230_vm5 = vweird.f32 %v209_v36 }
  0xb1   :  { %v212_v38 = vsub.f32 1.0, %v211_v37 }
  0xb2   :  { %v237_v52 = vor.u32 1.1754944e-38, %v236_v45  ;;  %vm235_vm8 = vcmp.eq.f32.partialorder %v234_v48, 8.507059e+37 }
  0xb3   :  { %v213_v39 = vmul.f32 %v450_v35, %v212_v38 }
  0xb5   :  { %v214_v42 = vadd.f32 %v450_v35, %v213_v39 }
  0xb6   :  { %v452_v40 = vpop.eup %451 }
  0xb7   :  { %v226_v41 = vmul.f32 %v452_v40, %v209_v36  ;;  %vm231_vm3 = vweird.f32 %v452_v40  ;;  %v218_v49 = vsel %vm217_vm4, %v450_v35, %v214_v42 }
  0xb8   :  { %vm232_vm6 = vmor %vm230_vm5, %vm231_vm3  ;;  %v223_v54 = vsel %vm220_vm7, %v222_v51, %v218_v49 }
  0xb9   :  { %v227_v43 = vsub.f32 1.0, %v226_v41 }
  0xbb   :  { %v228_v47 = vmul.f32 %v452_v40, %v227_v43 }
  0xbd   :  { %v229_v50 = vadd.f32 %v452_v40, %v228_v47 }
  0xbf   :  { %v233_v53 = vsel %vm232_vm6, %v452_v40, %v229_v50 }
  0xc0   :  { %v238_v55 = vsel %vm235_vm8, %v237_v52, %v233_v53 }
  0xc1   :  { %v240_v56 = vpack.c.bf16 %v238_v55, %v223_v54 }
  0xc3   :  { %317 = vmatmul.bf16.vlgmr.msra.gmra.mxu3 %v240_v56 }
 0x146   :  { %v318_v58 = vpop.f32.mrf.mxu3 }
 0x147   :  { %v319_v59 = vadd.f32 %v444_v57, %v318_v58 }
 0x149   :  { %323 = vst [vmem:[#allocation8] sm:$0xff] %v319_v59 }
 0x14e   :  { %v320_v60 = vpop.f32.mrf.mxu3 }
 0x14f   :  { %v321_v61 = vadd.f32 %v444_v57, %v320_v60 }
 0x151   :  { %324 = vst [vmem:[#allocation8 + $0x8] sm:$0xff] %v321_v61 }
 0x152   :  { %337 = dma.vmem_to_hbm [thread:$0]  %s330_s11, 256, %s332_s14, [#allocation4], %s561_s15, %s561_s15, %s562_s16  }
 0x153   :  { %553 = dma.done.wait [#allocation4], 256  }
 0x154   :  { %554 = vsyncadd [#allocation4], 4294967040 }
 0x155   :  { %342 = vsyncpa [#allocation3], 1 }
 0x156   :  { %343 = vsyncpa [#allocation6], 1 }
 0x157   :  { %344 = vsyncpa [#allocation4], 1 }

// kernel: tpu_custom_call.1
= control target key start
LH: loop header
LB: loop body
LE: loop exit
PB: predicated region body
PF: predicated region fallthrough
CT: control target
= control target key end

     0   :  { %10 = vsyncpa [#allocation3], 0  ;;  %s611_s0 = inlined_call_operand.hbm [shape: bf16[3,16,32], index: 0, kind: input, shape index: {}]   ;;  %s612_s1 = inlined_call_operand.hbm [shape: bf16[3,32,128], index: 1, kind: input, shape index: {}]   ;;  %s613_s2 = inlined_call_operand.vmem [shape: f32[1,128], index: 2, kind: input, shape index: {}]   ;;  %s614_s3 = inlined_call_operand.hbm [shape: bf16[128,128], index: 3, kind: input, shape index: {}]   ;;  %s615_s4 = inlined_call_operand.vmem [shape: f32[1,128], index: 4, kind: input, shape index: {}]   ;;  %s616_s5 = inlined_call_operand.hbm [shape: f32[16,128], index: 5, kind: output, shape index: {}]  }
   0x1   :  { %11 = vsyncpa [#allocation6], 0 }
   0x2   :  { %12 = vsyncpa [#allocation4], 0  ;;  %s30_s20 = sshll.u32 %s612_s1, 4  ;;  %s555_s21 = smov [#allocation5]   ;;  %s31_s20 = int_to_ptr.hbm [resolvable:$true] %s30_s20 }
   0x3   :  { %s32_s22 = sshll.u32 %s555_s21, 4  ;;  %s17_s25 = sshll.u32 %s611_s0, 4  ;;  %s33_s22 = int_to_ptr.vmem [resolvable:$true] %s32_s22  ;;  %s18_s25 = int_to_ptr.hbm [resolvable:$true] %s17_s25 }
   0x4   :  { %s556_s26 = smov 64   ;;  %s557_s27 = smov 4  }
   0x5   :  { %38 = dma.hbm_to_vmem [thread:$0]  %s31_s20, 768, %s33_s22, [#allocation6], %s556_s26, %s556_s26, %s557_s27  }
   0x6   :  { %s558_s28 = smov [#allocation2]   ;;  %s45_s7 = sshll.u32 %s614_s3, 4  ;;  %s46_s7 = int_to_ptr.hbm [resolvable:$true] %s45_s7 }
   0x7   :  { %s19_s29 = sshll.u32 %s558_s28, 4  ;;  %s559_s1 = smov [#allocation7]   ;;  %s20_s29 = int_to_ptr.vmem [resolvable:$true] %s19_s29 }
   0x8   :  { %25 = dma.hbm_to_vmem [thread:$0]  %s18_s25, 384, %s20_s29, [#allocation3], %s556_s26, %s556_s26, %s557_s27  }
   0x9   :  { %s47_s8 = sshll.u32 %s559_s1, 4  ;;  %s48_s8 = int_to_ptr.vmem [resolvable:$true] %s47_s8 }
   0xa   :  { %53 = dma.hbm_to_vmem [thread:$0]  %s46_s7, 1024, %s48_s8, [#allocation6], %s556_s26, %s556_s26, %s557_s27  }
   0xb   :  { %549 = dma.done.wait [#allocation3], 384  }
   0xc   :  { %550 = vsyncadd [#allocation3], 4294966912 }
   0xd   :  { %551 = dma.done.wait [#allocation6], 1792  }
   0xe   :  { %552 = vsyncadd [#allocation6], 4294965504  ;;  %v420_v0 = vld [vmem:[#allocation5 + $0x8] sm:$0xff]  ;;  %v423_v1 = vld [vmem:[#allocation5 + $0x18] sm:$0xff]  ;;  %vm96_vm0 = vcmask 261120   ;;  %s560_s10 = smov [#allocation8]  }
   0xf   :  { %v426_v2 = vld [vmem:[#allocation5 + $0x28] sm:$0xff]  ;;  %106 = vmatpush.bf16.msra.mxu0 %v420_v0  ;;  %148 = vmatpush.bf16.msra.mxu1 %v423_v1  ;;  %v419_v3 = vld [vmem:[#allocation5] sm:$0xff]  ;;  %v422_v4 = vld [vmem:[#allocation5 + $0x10] sm:$0xff]  ;;  %s329_s11 = sshll.u32 %s560_s10, 4  ;;  %s331_s14 = sshll.u32 %s616_s5, 4  ;;  %s330_s11 = int_to_ptr.vmem [resolvable:$true] %s329_s11  ;;  %s332_s14 = int_to_ptr.hbm [resolvable:$true] %s331_s14 }
  0x10   :  { %192 = vmatpush.bf16.msra.mxu2 %v426_v2  ;;  %v425_v5 = vld [vmem:[#allocation5 + $0x20] sm:$0xff]  ;;  %v418_v6 = vld [vmem:[#allocation2] sm:$0xff]  ;;  %v421_v7 = vld [vmem:[#allocation2 + $0x8] sm:$0xff]  ;;  %s561_s15 = smov 128   ;;  %s562_s16 = smov 8  }
  0x11   :  { %v424_v8 = vld [vmem:[#allocation2 + $0x10] sm:$0xff]  ;;  %v434_v9 = vld [vmem:[#allocation7 + $0x38] sm:$0xff]  ;;  %v433_v10 = vld [vmem:[#allocation7 + $0x30] sm:$0xff] }
  0x12   :  { %309 = vmatpush.bf16.msra.mxu3 %v434_v9  ;;  %v432_v11 = vld [vmem:[#allocation7 + $0x28] sm:$0xff]  ;;  %v431_v12 = vld [vmem:[#allocation7 + $0x20] sm:$0xff]  ;;  %v443_v13 = vld [vmem:[%s613_s2] ss:$0 sm:$0xff] }
  0x13   :  { %107 = vmatpush.bf16.msra.mxu0 %v419_v3  ;;  %149 = vmatpush.bf16.msra.mxu1 %v422_v4  ;;  %v430_v14 = vld [vmem:[#allocation7 + $0x18] sm:$0xff]  ;;  %v429_v17 = vld [vmem:[#allocation7 + $0x10] sm:$0xff]  ;;  %v428_v20 = vld [vmem:[#allocation7 + $0x8] sm:$0xff] }
  0x14   :  { %193 = vmatpush.bf16.msra.mxu2 %v425_v5  ;;  %v427_v24 = vld [vmem:[#allocation7] sm:$0xff]  ;;  %v444_v57 = vld [vmem:[%s615_s4] ss:$0 sm:$0xff] }
  0x16   :  { %357 = vmatmul.msk.bf16.vlgmr.msra.gmra.mxu0 %vm96_vm0, %v418_v6  ;;  %370 = vmatmul.msk.bf16.vlgmr.msra.gmra.mxu1 %vm96_vm0, %v421_v7 }
  0x17   :  { %383 = vmatmul.msk.bf16.vlgmr.msra.gmra.mxu2 %vm96_vm0, %v424_v8  ;;  %310 = vmatpush.bf16.msra.mxu3 %v433_v10 }
  0x1b   :  { %311 = vmatpush.bf16.msra.mxu3 %v432_v11 }
  0x1f   :  { %312 = vmatpush.bf16.msra.mxu3 %v431_v12 }
  0x23   :  { %313 = vmatpush.bf16.msra.mxu3 %v430_v14 }
  0x27   :  { %314 = vmatpush.bf16.msra.mxu3 %v429_v17 }
  0x2b   :  { %315 = vmatpush.bf16.msra.mxu3 %v428_v20 }
  0x2f   :  { %316 = vmatpush.bf16.msra.mxu3 %v427_v24 }
  0x93   :  { %v109_v15 = vpop.f32.mrf.mxu0  ;;  %v151_v18 = vpop.f32.mrf.mxu1 }
  0x94   :  { %v110_v16 = vadd.f32 %v443_v13, %v109_v15 }
  0x96   :  { %v156_v19 = vadd.f32 %v151_v18, %v110_v16 }
  0x9a   :  { %v195_v21 = vpop.f32.mrf.mxu2 }
  0x9b   :  { %v200_v22 = vadd.f32 %v195_v21, %v156_v19  ;;  %v111_v23 = vpop.f32.mrf.mxu0  ;;  %v153_v27 = vpop.f32.mrf.mxu1 }
  0x9c   :  { %v112_v26 = vadd.f32 %v443_v13, %v111_v23 }
  0x9d   :  { %v384_v25 = vmul.f32 -1.442695, %v200_v22 }
  0x9e   :  { %v157_v28 = vadd.f32 %v153_v27, %v112_v26 }
  0x9f   :  { %445 = vpow2.f32 %v384_v25 }
  0xa2   :  { %v197_v29 = vpop.f32.mrf.mxu2 }
  0xa3   :  { %v201_v30 = vadd.f32 %v197_v29, %v157_v28 }
  0xa5   :  { %v446_v31 = vpop.eup %445  ;;  %v385_v32 = vmul.f32 -1.442695, %v201_v30 }
  0xa6   :  { %v208_v33 = vadd.f32 1.0, %v446_v31 }
  0xa7   :  { %447 = vpow2.f32 %v385_v32 }
  0xa8   :  { %449 = vrcp.f32 %v208_v33  ;;  %vm215_vm2 = vweird.f32 %v208_v33  ;;  %v221_v44 = vand.u32 2147483648, %v208_v33  ;;  %v219_v46 = vand.u32 2147483647, %v208_v33 }
  0xaa   :  { %v222_v51 = vor.u32 1.1754944e-38, %v221_v44  ;;  %vm220_vm7 = vcmp.eq.f32.partialorder %v219_v46, 8.507059e+37 }
  0xad   :  { %v448_v34 = vpop.eup %447 }
  0xae   :  { %v450_v35 = vpop.eup %449  ;;  %v209_v36 = vadd.f32 1.0, %v448_v34 }
  0xaf   :  { %v211_v37 = vmul.f32 %v450_v35, %v208_v33  ;;  %vm216_vm1 = vweird.f32 %v450_v35 }
  0xb0   :  { %451 = vrcp.f32 %v209_v36  ;;  %v236_v45 = vand.u32 2147483648, %v209_v36  ;;  %v234_v48 = vand.u32 2147483647, %v209_v36  ;;  %vm217_vm4 = vmor %vm215_vm2, %vm216_vm1  ;;  %vm230_vm5 = vweird.f32 %v209_v36 }
  0xb1   :  { %v212_v38 = vsub.f32 1.0, %v211_v37 }
  0xb2   :  { %v237_v52 = vor.u32 1.1754944e-38, %v236_v45  ;;  %vm235_vm8 = vcmp.eq.f32.partialorder %v234_v48, 8.507059e+37 }
  0xb3   :  { %v213_v39 = vmul.f32 %v450_v35, %v212_v38 }
  0xb5   :  { %v214_v42 = vadd.f32 %v450_v35, %v213_v39 }
  0xb6   :  { %v452_v40 = vpop.eup %451 }
  0xb7   :  { %v226_v41 = vmul.f32 %v452_v40, %v209_v36  ;;  %vm231_vm3 = vweird.f32 %v452_v40  ;;  %v218_v49 = vsel %vm217_vm4, %v450_v35, %v214_v42 }
  0xb8   :  { %vm232_vm6 = vmor %vm230_vm5, %vm231_vm3  ;;  %v223_v54 = vsel %vm220_vm7, %v222_v51, %v218_v49 }
  0xb9   :  { %v227_v43 = vsub.f32 1.0, %v226_v41 }
  0xbb   :  { %v228_v47 = vmul.f32 %v452_v40, %v227_v43 }
  0xbd   :  { %v229_v50 = vadd.f32 %v452_v40, %v228_v47 }
  0xbf   :  { %v233_v53 = vsel %vm232_vm6, %v452_v40, %v229_v50 }
  0xc0   :  { %v238_v55 = vsel %vm235_vm8, %v237_v52, %v233_v53 }
  0xc1   :  { %v240_v56 = vpack.c.bf16 %v238_v55, %v223_v54 }
  0xc3   :  { %317 = vmatmul.bf16.vlgmr.msra.gmra.mxu3 %v240_v56 }
 0x146   :  { %v318_v58 = vpop.f32.mrf.mxu3 }
 0x147   :  { %v319_v59 = vadd.f32 %v444_v57, %v318_v58 }
 0x149   :  { %323 = vst [vmem:[#allocation8] sm:$0xff] %v319_v59 }
 0x14e   :  { %v320_v60 = vpop.f32.mrf.mxu3 }
 0x14f   :  { %v321_v61 = vadd.f32 %v444_v57, %v320_v60 }
 0x151   :  { %324 = vst [vmem:[#allocation8 + $0x8] sm:$0xff] %v321_v61 }
 0x152   :  { %337 = dma.vmem_to_hbm [thread:$0]  %s330_s11, 256, %s332_s14, [#allocation4], %s561_s15, %s561_s15, %s562_s16  }
 0x153   :  { %553 = dma.done.wait [#allocation4], 256  }
 0x154   :  { %554 = vsyncadd [#allocation4], 4294967040 }
 0x155   :  { %342 = vsyncpa [#allocation3], 1 }
 0x156   :  { %343 = vsyncpa [#allocation6], 1 }
 0x157   :  { %344 = vsyncpa [#allocation4], 1 }

</bundles_post_ra>
